<compile_context>
chip_gen: v5e
topology: v5e:2x2
jax: 0.10.0
libtpu: 0.0.40
codegen_flags: <defaults>
</compile_context>

<pallas_src>
import jax
import jax.numpy as jnp
from jax.experimental import pallas as pl
from jax.experimental.pallas import tpu as pltpu


def _round_up(x, m):
    return ((x + m - 1) // m) * m


def _vmem_cap_bytes():
    # ~3/4 of the physical per-core VMEM; 48 MiB fallback is safe on every generation
    # (v7x has only 64 MiB per TensorCore, v5e/v6e have 128 MiB).
    try:
        return int(pltpu.get_tpu_info().vmem_capacity_bytes) * 3 // 4
    except Exception:
        return 48 << 20


# --------------------------------------------------------------------------------------
# Kernel 1: K-streamed gram matmul   (B*d, D) @ (D, P*d)   -- the MXU hot path
# --------------------------------------------------------------------------------------
def _gram_kernel(x_ref, p_ref, out_ref, acc_ref):
    # x_ref:   (tile_m, tk)     lane-dense rows of the stacked X^T bases
    # p_ref:   (tk, tile_n)     slab of prototype bases for this (k, j) block
    # out_ref: (tile_m, tile_n)
    # acc_ref: (tile_m, tile_n) f32 accumulator, resident across the K axis
    @pl.when(pl.program_id(2) == 0)
    def _():
        acc_ref[...] = jnp.zeros_like(acc_ref)

    acc_ref[...] += jnp.dot(x_ref[...], p_ref[...], preferred_element_type=jnp.float32)

    @pl.when(pl.program_id(2) == pl.num_programs(2) - 1)
    def _():
        out_ref[...] = acc_ref[...].astype(out_ref.dtype)


def gram_matrices(xs_flat, protos_flat, *, tile_m=128, tile_n=512, tile_k=1024):
    """Compute xs_flat @ protos_flat with (M, N, K) tiling and an f32 accumulator.

    xs_flat:     (B*d, D)  lane-dense (last dim = D)
    protos_flat: (D, P*d)  lane-dense (last dim = P*d)
    returns:     (B*d, P*d) float32
    """
    M, D = xs_flat.shape
    D2, N = protos_flat.shape
    assert D == D2
    elt = jnp.dtype(xs_flat.dtype).itemsize

    # --- K (contraction) tiling: full-D blocks when D is modest, streamed otherwise.
    if D > tile_k:
        tk = tile_k                      # multiple of 8 and 128
        Dp = _round_up(D, tk)            # zero padding along K is mathematically neutral
    else:
        tk = D
        Dp = D

    # --- N tiling: keep the whole prototype slab resident per K step when small (it is
    #     then fetched once and reused across every row tile); otherwise 128-lane tiles.
    Np_full = _round_up(N, 128)
    if Np_full * tk * elt <= (4 << 20):
        tn = Np_full
    else:
        tn = min(tile_n, Np_full)
    Np = _round_up(N, tn)

    # --- M (row) tiling; guarantee >=2 tiles on a "parallel" axis so both v7x TCs work.
    tm = min(tile_m, _round_up(M, 8))
    Mp = _round_up(M, tm)
    if Mp // tm == 1 and Np // tn == 1 and tm > 8:
        tm = max(8, _round_up(tm // 2, 8))
        Mp = _round_up(M, tm)

    if (Mp, Dp) != (M, D):
        xs_flat = jnp.pad(xs_flat, ((0, Mp - M), (0, Dp - D)))
    if (Dp, Np) != (D, N):
        protos_flat = jnp.pad(protos_flat, ((0, Dp - D), (0, Np - N)))

    grid = (Mp // tm, Np // tn, Dp // tk)

    # Double-buffered inputs + double-buffered output tile + accumulator + headroom,
    # clamped below physical VMEM (v7x: 64 MiB per TC -> clamp at ~48 MiB).
    vmem_bytes = (2 * (tm * tk + tk * tn) * elt
                  + 2 * tm * tn * 4
                  + tm * tn * 4
                  + (2 << 20))
    vmem_bytes = int(min(max(vmem_bytes, 8 << 20), _vmem_cap_bytes()))

    out = pl.pallas_call(
        _gram_kernel,
        out_shape=jax.ShapeDtypeStruct((Mp, Np), jnp.float32),
        grid_spec=pltpu.PrefetchScalarGridSpec(
            num_scalar_prefetch=0,
            grid=grid,
            in_specs=[
                pl.BlockSpec((tm, tk), lambda i, j, k: (i, k)),
                pl.BlockSpec((tk, tn), lambda i, j, k: (k, j)),
            ],
            out_specs=pl.BlockSpec((tm, tn), lambda i, j, k: (i, j)),
            scratch_shapes=[pltpu.VMEM((tm, tn), jnp.float32)],
        ),
        compiler_params=pltpu.CompilerParams(
            dimension_semantics=("parallel", "parallel", "arbitrary"),
            vmem_limit_bytes=vmem_bytes,
        ),
        cost_estimate=pl.CostEstimate(
            flops=2 * Mp * Dp * Np,
            transcendentals=0,
            bytes_accessed=int(elt * (Mp * Dp * (Np // tn) + Dp * Np * (Mp // tm))
                               + 4 * Mp * Np),
        ),
    )(xs_flat, protos_flat)

    if (Mp, Np) != (M, N):
        out = out[:M, :N]
    return out


# --------------------------------------------------------------------------------------
# Kernel 2: lane-dense geodesic-distance epilogue (VPU/EUP, no weight matrix)
#   out[b, p] = sum_j relevances[j] * arccos(clip(sigma[j, b, p]))^2
# --------------------------------------------------------------------------------------
def _distance_kernel(r_ref, s_ref, o_ref):
    # r_ref: (1, d)            relevances in SMEM (scalar reads)
    # s_ref: (d, tile_b, tile_p) canonical correlations, subspace index j leading
    # o_ref: (tile_b, tile_p)
    d = s_ref.shape[0]
    acc = jnp.zeros(o_ref.shape, jnp.float32)
    for j in range(d):                                     # d is tiny (== dim_of_subspace)
        theta = jnp.arccos(jnp.clip(s_ref[j], -1.0, 1.0))
        acc = acc + r_ref[0, j] * (theta * theta)
    o_ref[...] = acc


def geodesic_distances(svals_jbp, relevances, *, tile_b=256):
    """svals_jbp: (d, B, P) singular values (j-major); relevances: (1, d)."""
    d, B, P = svals_jbp.shape

    # P is the lane axis: one full tile when P <= 128 (full-dim blocks are legal),
    # otherwise 128-lane chunks so output stores stay unmasked.
    if P <= 128:
        tp, Pp = P, P
    else:
        tp = 128
        Pp = _round_up(P, tp)
    tb = min(tile_b, B)
    Bp = _round_up(B, tb)
    if (Bp, Pp) != (B, P):
        # Padded sigmas are 0 -> arccos(0) = pi/2 only pollutes padded rows/cols,
        # which are sliced off below.
        svals_jbp = jnp.pad(svals_jbp, ((0, 0), (0, Bp - B), (0, Pp - P)))

    grid = (Bp // tb, Pp // tp)
    vmem_bytes = int(min(max(2 * d * tb * tp * 4 + 2 * tb * tp * 4 + (2 << 20), 4 << 20),
                         _vmem_cap_bytes()))

    out = pl.pallas_call(
        _distance_kernel,
        out_shape=jax.ShapeDtypeStruct((Bp, Pp), jnp.float32),
        grid_spec=pltpu.PrefetchScalarGridSpec(
            num_scalar_prefetch=0,
            grid=grid,
            in_specs=[
                pl.BlockSpec(memory_space=pltpu.MemorySpace.SMEM),        # relevances
                pl.BlockSpec((d, tb, tp), lambda i, q: (0, i, q)),        # singular values
            ],
            out_specs=pl.BlockSpec((tb, tp), lambda i, q: (i, q)),
        ),
        compiler_params=pltpu.CompilerParams(
            dimension_semantics=("parallel", "parallel"),
            vmem_limit_bytes=vmem_bytes,
        ),
        cost_estimate=pl.CostEstimate(
            flops=4 * Bp * d * Pp,
            transcendentals=Bp * d * Pp,
            bytes_accessed=4 * (Bp * d * Pp + Bp * Pp),
        ),
    )(relevances.astype(jnp.float32), svals_jbp.astype(jnp.float32))

    if (Bp, Pp) != (B, P):
        out = out[:B, :P]
    return out


# --------------------------------------------------------------------------------------
# PrototypeLayer equivalent (deterministic synthetic init)
# --------------------------------------------------------------------------------------
class PrototypeLayerPallas:
    def __init__(self, num_prototypes, num_classes, dim_of_data, dim_of_subspace,
                 metric_type='geodesic', key=None, compute_dtype=jnp.float32):
        self.nchannels = dim_of_data
        self.dim_of_subspaces = dim_of_subspace
        self.metric_type = metric_type
        # TODO(synk): compute_dtype=jnp.bfloat16 doubles MXU throughput on v6e/v7x and
        # halves DMA bytes, but arccos is ill-conditioned near sigma~1 -- keep f32 default.
        self.compute_dtype = compute_dtype
        if key is None:
            key = jax.random.PRNGKey(42)

        # init_randn equivalent: random orthonormal bases on the Grassmann manifold.
        raw = jax.random.normal(key, (num_prototypes, dim_of_data, dim_of_subspace),
                                dtype=jnp.float32)
        q, _ = jnp.linalg.qr(raw)                          # (P, D, d), orthonormal columns
        self.xprotos = q
        self.yprotos = jnp.arange(num_prototypes, dtype=jnp.int32) % num_classes
        onehot = jax.nn.one_hot(self.yprotos, num_classes, dtype=jnp.int32)   # (P, C)
        self.yprotos_mat = onehot.T                        # (C, P)
        self.yprotos_comp_mat = 1 - self.yprotos_mat
        self.number_of_prototypes = num_prototypes
        self.relevances = jnp.ones((1, dim_of_subspace), dtype=jnp.float32) / dim_of_subspace

        # Hoisted constant prep: lane-dense prototype slab (D, P*d), built once (not per call).
        P, D, d = q.shape
        self.protos_flat = jnp.transpose(q, (1, 0, 2)).reshape(D, P * d).astype(compute_dtype)

    def __call__(self, xs_subspace):
        B, D, d = xs_subspace.shape
        P = self.xprotos.shape[0]

        # Lane-dense LHS: rows are the columns of every X_b -> (B*d, D), last dim = D.
        xs_flat = jnp.swapaxes(xs_subspace, 1, 2).reshape(B * d, D).astype(self.compute_dtype)

        gram_flat = gram_matrices(xs_flat, self.protos_flat)            # (B*d, P*d) f32

        # Regroup (b, i, p, j) -> (b, p, i, j): M[b, p] = X_b^T P_p, tiny d x d matrices.
        gram = jnp.swapaxes(gram_flat.reshape(B, d, P, d), 1, 2)        # (B, P, d, d)

        # Singular values via symmetric eig of the SPD matrix M^T M (sigma = sqrt(eig)),
        # sorted descending to match torch.linalg.svd ordering (relevances are per-index).
        # TODO(synk): a fixed-sweep Jacobi on the 8x8 grams fused into kernel 1's epilogue
        # would keep gram -> theta^2 -> weighted reduce entirely in VMEM; left in XLA here.
        a = jnp.einsum('bpki,bpkj->bpij', gram, gram,
                       precision=jax.lax.Precision.HIGHEST)             # (B, P, d, d) SPD
        eig = jnp.linalg.eigvalsh(a)                                    # ascending
        svals = jnp.sqrt(jnp.clip(eig, 0.0, None))[..., ::-1]           # descending (B, P, d)

        # j-major layout (d, B, P): P on the lane axis, per-j planes are contiguous DMAs.
        svals_jbp = jnp.transpose(svals, (2, 0, 1))
        return geodesic_distances(svals_jbp, self.relevances)


# --------------------------------------------------------------------------------------
# Pure-JAX reference for validation
# --------------------------------------------------------------------------------------
def reference_forward(xs, xprotos, relevances):
    m = jnp.einsum('bki,pkj->bpij', xs, xprotos, precision=jax.lax.Precision.HIGHEST)
    s = jnp.linalg.svd(m, compute_uv=False)
    theta = jnp.arccos(jnp.clip(s, -1.0, 1.0))
    return jnp.sum(relevances[0] * theta * theta, axis=-1)


if __name__ == "__main__":
    num_prototypes, num_classes = 16, 4
    dim_of_data, dim_of_subspace = 128, 8
    batch = 4

    layer = PrototypeLayerPallas(num_prototypes, num_classes,
                                 dim_of_data, dim_of_subspace)

    key = jax.random.PRNGKey(0)
    raw = jax.random.normal(key, (batch, dim_of_data, dim_of_subspace), dtype=jnp.float32)
    xs_subspace, _ = jnp.linalg.qr(raw)     # orthonormal input subspaces (Grassmann points)

    dists = layer(xs_subspace)
    dists = jax.block_until_ready(dists)

    ref = reference_forward(xs_subspace, layer.xprotos, layer.relevances)
    assert dists.shape == (batch, num_prototypes), dists.shape
    assert jnp.allclose(dists, ref, atol=2e-3, rtol=2e-3), (dists, ref)
    print("KERNEL_OK")
</pallas_src>

<mosaic_0001>
module attributes {stable_mosaic.version = 11 : i64} {
  func.func @_gram_kernel(%arg0: i32, %arg1: i32, %arg2: i32, %arg3: memref<16x128xf32, #tpu.memory_space<vmem>>, %arg4: memref<128x128xf32, #tpu.memory_space<vmem>>, %arg5: memref<16x128xf32, #tpu.memory_space<vmem>>, %arg6: memref<16x128xf32, #tpu.memory_space<vmem>>) attributes {dimension_semantics = [#tpu.dimension_semantics<parallel>, #tpu.dimension_semantics<parallel>, #tpu.dimension_semantics<arbitrary>], iteration_bounds = array<i64: 2, 1, 1>, scalar_prefetch = 0 : i64, scratch_operands = 1 : i64, tpu.core_type = #tpu.core_type<tc>, window_params = [{transform_indices = @transform_0, window_bounds = array<i64: 16, 128>}, {transform_indices = @transform_1, window_bounds = array<i64: 128, 128>}, {transform_indices = @transform_2, window_bounds = array<i64: 16, 128>}]} {
    %c0_i32 = arith.constant 0 : i32
    %0 = arith.cmpi eq, %arg2, %c0_i32 : i32
    %1 = arith.extui %0 : i1 to i32
    %c0_i32_0 = arith.constant 0 : i32
    %2 = arith.cmpi ne, %1, %c0_i32_0 : i32
    scf.if %2 {
      %cst_10 = arith.constant 0.000000e+00 : f32
      %12 = vector.broadcast %cst_10 : f32 to vector<16x128xf32>
      %c0_11 = arith.constant 0 : index
      %c0_12 = arith.constant 0 : index
      %13 = vector.load %arg6[%c0_11, %c0_12] : memref<16x128xf32, #tpu.memory_space<vmem>>, vector<16x128xf32>
      tpu.vector_store %arg6[%c0_11, %c0_12], %12 {strides = array<i32>} : memref<16x128xf32, #tpu.memory_space<vmem>>, vector<16x128xf32>,
    } else {
    }
    %c0 = arith.constant 0 : index
    %c0_1 = arith.constant 0 : index
    %3 = vector.load %arg6[%c0, %c0_1] : memref<16x128xf32, #tpu.memory_space<vmem>>, vector<16x128xf32>
    %c0_2 = arith.constant 0 : index
    %c0_3 = arith.constant 0 : index
    %4 = vector.load %arg3[%c0_2, %c0_3] : memref<16x128xf32, #tpu.memory_space<vmem>>, vector<16x128xf32>
    %c0_4 = arith.constant 0 : index
    %c0_5 = arith.constant 0 : index
    %5 = vector.load %arg4[%c0_4, %c0_5] : memref<128x128xf32, #tpu.memory_space<vmem>>, vector<128x128xf32>
    %cst = arith.constant dense<0.000000e+00> : vector<16x128xf32>
    %6 = tpu.matmul %4, %5, %cst {dimension_numbers = #tpu.dot_dimension_numbers<[1], [0], [0], [1], [0, 0, 1, 1], [], []>} : vector<16x128xf32>, vector<128x128xf32>, vector<16x128xf32> -> vector<16x128xf32>
    %7 = arith.addf %3, %6 : vector<16x128xf32>
    %c0_6 = arith.constant 0 : index
    %c0_7 = arith.constant 0 : index
    %8 = vector.load %arg6[%c0_6, %c0_7] : memref<16x128xf32, #tpu.memory_space<vmem>>, vector<16x128xf32>
    tpu.vector_store %arg6[%c0_6, %c0_7], %7 {strides = array<i32>} : memref<16x128xf32, #tpu.memory_space<vmem>>, vector<16x128xf32>,
    %c0_i32_8 = arith.constant 0 : i32
    %9 = arith.cmpi eq, %arg2, %c0_i32_8 : i32
    %10 = arith.extui %9 : i1 to i32
    %c0_i32_9 = arith.constant 0 : i32
    %11 = arith.cmpi ne, %10, %c0_i32_9 : i32
    scf.if %11 {
      %c0_10 = arith.constant 0 : index
      %c0_11 = arith.constant 0 : index
      %12 = vector.load %arg6[%c0_10, %c0_11] : memref<16x128xf32, #tpu.memory_space<vmem>>, vector<16x128xf32>
      %c0_12 = arith.constant 0 : index
      %c0_13 = arith.constant 0 : index
      %13 = vector.load %arg5[%c0_12, %c0_13] : memref<16x128xf32, #tpu.memory_space<vmem>>, vector<16x128xf32>
      tpu.vector_store %arg5[%c0_12, %c0_13], %12 {strides = array<i32>} : memref<16x128xf32, #tpu.memory_space<vmem>>, vector<16x128xf32>,
    } else {
    }
    return
  }
  func.func @transform_0(%arg0: i32, %arg1: i32, %arg2: i32) -> (i32, i32) {
    %c0_i32 = arith.constant 0 : i32
    return %arg0, %arg2 : i32, i32
  }
  func.func @transform_1(%arg0: i32, %arg1: i32, %arg2: i32) -> (i32, i32) {
    %c0_i32 = arith.constant 0 : i32
    return %arg2, %arg1 : i32, i32
  }
  func.func @transform_2(%arg0: i32, %arg1: i32, %arg2: i32) -> (i32, i32) {
    %c0_i32 = arith.constant 0 : i32
    return %arg0, %arg1 : i32, i32
  }
}

</mosaic_0001>

<bundles_post_ra>
// kernel: tpu_custom_call.1
= control target key start
LH: loop header
LB: loop body
LE: loop exit
PB: predicated region body
PF: predicated region fallthrough
CT: control target
= control target key end

     0   :  { %7 = vsyncpa [#allocation4], 0  ;;  %s841_s0 = inlined_call_operand.hbm [shape: f32[32,128], index: 0, kind: input, shape index: {}]   ;;  %s842_s1 = inlined_call_operand.hbm [shape: f32[128,128], index: 1, kind: input, shape index: {}]   ;;  %s843_s2 = inlined_call_operand.hbm [shape: f32[32,128], index: 2, kind: output, shape index: {}]  }
   0x1   :  { %9 = vsyncpa [#allocation4 + $0x1], 0 }
   0x2   :  { %10 = vsyncpa [#allocation7], 0 }
   0x3   :  { %11 = vsyncpa [#allocation5], 0 }
   0x4   :  { %13 = vsyncpa [#allocation5 + $0x1], 0  ;;  %s678_s9 = smov 0   ;;  %s680_s10 = smov 0  }
   0x5   :  { %s682_s11 = smov 0   ;;  %s684_s12 = smov 0  }
   0x6   :  { %s686_s13 = smov 0   ;;  %s688_s14 = smov 0  }
   0x7 LB: > { %s398_s15 = sadd.s32 4294967295, %s656_s14   ;;  %s399_s16 = sadd.s32 4294967294, %s656_s14   ;;  %s656_s14 = sphi %s688_s14, %s19_s14   ;;  %s652_s13 = sphi %s686_s13, %s855_s13   ;;  %s648_s12 = sphi %s684_s12, %s854_s12   ;;  %s644_s11 = sphi %s682_s11, %s853_s11   ;;  %s640_s10 = sphi %s680_s10, %s852_s10   ;;  %s636_s9 = sphi %s678_s9, %s851_s9  }
   0x8   : > { %p60_p0 = scmp.ne.s32.totalorder %s640_s10, %s636_s9  ;;  %p712_p1 = scmp.eq.s32.totalorder %s398_s15, 0 }
   0x9   : > { %p716_p2 = scmp.eq.s32.totalorder %s398_s15, 1  ;;  %p120_p3 = scmp.eq.s32.totalorder %s399_s16, 1 }
   0xa   : > { %p722_p4 = por %p712_p1, %p60_p0  ;;  %p400_p5 = scmp.ge.s32.totalorder %s656_s14, 1 }
   0xb   : > { %p727_p6 = por %p120_p3, %p60_p0  ;;  %p127_p7 = scmp.lt.s32.totalorder %s656_s14, 3 }
   0xc   : > { %s142_s23 = sshll.u32 %s842_s1, 4  ;;  %s658_s25 = smov [#allocation6]   ;;  %s143_s23 = int_to_ptr.hbm [resolvable:$true] %s142_s23 }
   0xd   : > { %p735_p8 = pnand %p400_p5, %p127_p7  ;;  %s144_s26 = sshll.u32 %s658_s25, 4  ;;  %s145_s26 = int_to_ptr.vmem [resolvable:$true] %s144_s26 }
   0xe   : > { %p402_p11 = scmp.ge.s32.totalorder %s656_s14, 2  ;;  %s659_s27 = smov 128  }
   0xf   : > { %p441_p9 = pneg %p735_p8  ;;  %s660_s28 = smov 8  }
  0x10   : > { %s38_s29 = sadd.s32 1, %s652_s13  ;;  %s47_s30 = sadd.s32 1, %s644_s11 }
  0x11   : > { %p442_p10 = pnand %p441_p9, %p712_p1  ;;  %p40_p12 = scmp.ge.s32.totalorder %s38_s29, 2 }
  0x12   : > { %p54_p13 = scmp.ne.s32.totalorder %s644_s11, %s640_s10  ;;  %p55_p0 = scmp.eq.s32.totalorder %s656_s14, 0 }
  0x13   : > { %444 = dma.hbm_to_vmem [thread:$0]  (!%p442_p10), %s143_s23, 2048, %s145_s26, [#allocation7], %s659_s27, %s659_s27, %s660_s28  }
  0x14   : > { %s857_s29 = smov (%p40_p12, %s38_s29), 0  ;;  %p754_p3 = por %p55_p0, %p54_p13 }
  0x15   : > { %p760_p5 = por %p716_p2, %p54_p13  ;;  %s42_s5 = ssub.s32 %s652_s13, %s857_s29 }
  0x16   : > { %p454_p7 = scmp.lt.s32.totalorder %s656_s14, 2  ;;  %p45_p9 = scmp.eq.s32.totalorder %s42_s5, 0 }
  0x17   : > { %s158_s6 = sand.u32 1, %s644_s11   ;;  %s415_s15 = sshll.u32 %s652_s13, 4 }
  0x18   : > { %s403_s7 = sshll.u32 %s158_s6, 4  ;;  %s168_s22 = scalar_lea.hbm %s841_s0, %s415_s15 }
  0x19   : > { %s769_s8 = scalar_select %p45_p9, %s644_s11, %s47_s30  }
  0x1a   : > { %s162_s23 = scalar_lea.vmem [#allocation3], %s403_s7  ;;  %s169_s18 = sshll.u32 %s168_s22, 4  ;;  %s170_s18 = int_to_ptr.hbm [resolvable:$true] %s169_s18 }
  0x1b   : > { %s171_s25 = sshll.u32 %s162_s23, 4  ;;  %p446_p2 = pnand %p454_p7, %p754_p3  ;;  %s172_s25 = int_to_ptr.vmem [resolvable:$true] %s171_s25 }
  0x1c   : > { %s159_s26 = scalar_lea.sflag [#allocation4], %s158_s6  ;;  %183 = sbr.rel (%p735_p8) target bundleno = 199 (0xc7), region = 28 }
  0x1d   : > { %448 = dma.hbm_to_vmem [thread:$0]  (!%p446_p2), %s170_s18, 256, %s172_s25, %s159_s26, %s659_s27, %s659_s27, %s660_s28  }
  0x1e   : > { %s783_s30 = sand.u32 (!%p735_p8), 1, %s640_s10  }
  0x1f   : > { %s407_s5 = sshll.u32 (!%p735_p8), %s783_s30, 4  ;;  %s186_s7 = scalar_lea.sflag (!%p735_p8), [#allocation4], %s783_s30 }
  0x20   : > { %s789_s3 = scalar_lea.vmem (!%p735_p8), [#allocation3], %s407_s5 }
  0x21   : > { %623 = dma.done.wait (%p722_p4), %s186_s7, 256  }
  0x22   : > { %625 = vsyncadd (%p722_p4), %s186_s7, 4294967040 }
  0x23   : > { %627 = dma.done.wait (%p712_p1), [#allocation7], 2048  }
  0x24   : > { %629 = vsyncadd (%p712_p1), [#allocation7], 4294965248  ;;  %v244_v0 = vld [vmem:[#allocation6 + $0x78] sm:$0xff]  ;;  %v243_v1 = vld [vmem:[#allocation6 + $0x70] sm:$0xff]  ;;  %s416_s17 = sshll.u32 %s648_s12, 4  ;;  %s215_s28 = scalar_lea.vmem [#allocation8], %s407_s5 }
  0x25   : > { %245 = vmatpush.msra.mxu0 %v244_v0  ;;  %417 = vmatpush.msra.mxu1 %v244_v0  ;;  %v242_v2 = vld [vmem:[#allocation6 + $0x68] sm:$0xff]  ;;  %v241_v3 = vld [vmem:[#allocation6 + $0x60] sm:$0xff]  ;;  %v240_v4 = vld [vmem:[#allocation6 + $0x58] sm:$0xff]  ;;  %s292_s27 = scalar_lea.hbm %s843_s2, %s416_s17  ;;  %s293_s6 = sshll.u32 %s215_s28, 4  ;;  %s294_s6 = int_to_ptr.vmem [resolvable:$true] %s293_s6 }
  0x26   : > { %v239_v5 = vld [vmem:[#allocation6 + $0x50] sm:$0xff]  ;;  %v238_v6 = vld [vmem:[#allocation6 + $0x48] sm:$0xff]  ;;  %v237_v7 = vld [vmem:[#allocation6 + $0x40] sm:$0xff]  ;;  %s295_s15 = sshll.u32 %s292_s27, 4  ;;  %s280_s16 = scalar_lea.sflag [#allocation5], %s783_s30  ;;  %s296_s15 = int_to_ptr.hbm [resolvable:$true] %s295_s15 }
  0x27   : > { %246 = vmatpush.msra.mxu0 %v243_v1  ;;  %418 = vmatpush.msra.mxu1 %v243_v1  ;;  %v236_v8 = vld [vmem:[#allocation6 + $0x38] sm:$0xff]  ;;  %v235_v9 = vld [vmem:[#allocation6 + $0x30] sm:$0xff]  ;;  %v234_v10 = vld [vmem:[#allocation6 + $0x28] sm:$0xff]  ;;  %s584_s21 = sshra.s32 %s296_s15, 4  ;;  %s590_s25 = scalar_lea.hbm %s843_s2, 32  ;;  %s585_s21 = int_to_ptr.hbm [resolvable:$true] %s584_s21 }
  0x28   : > { %v233_v11 = vld [vmem:[#allocation6 + $0x20] sm:$0xff]  ;;  %v232_v12 = vld [vmem:[#allocation6 + $0x18] sm:$0xff]  ;;  %v231_v13 = vld [vmem:[#allocation6 + $0x10] sm:$0xff]  ;;  %s586_s22 = scalar_lea.hbm %s585_s21, 16  ;;  %p591_p10 = scmp.lt.s32.totalorder %s585_s21, %s843_s2 }
  0x29   : > { %247 = vmatpush.msra.mxu0 %v242_v2  ;;  %419 = vmatpush.msra.mxu1 %v242_v2  ;;  %v230_v14 = vld [vmem:[#allocation6 + $0x8] sm:$0xff]  ;;  %v229_v15 = vld [vmem:[#allocation6] sm:$0xff]  ;;  %p587_p1 = scmp.ne.s32.totalorder %s585_s21, %s586_s22  ;;  %p592_p12 = scmp.lt.s32.totalorder %s590_s25, %s586_s22 }
  0x2a   : > { %v227_v16 = vld [vmem:[%s789_s3] sm:$0xff]  ;;  %v228_v17 = vld [vmem:[%s789_s3 + $0x8] sm:$0xff] }
  0x2b   : > { %248 = vmatpush.msra.mxu0 %v241_v3  ;;  %420 = vmatpush.msra.mxu1 %v241_v3  ;;  %p588_p4 = pnand %p587_p1, %p760_p5  ;;  %p593_p13 = por %p592_p12, %p591_p10 }
  0x2d   : > { %249 = vmatpush.msra.mxu0 %v240_v4  ;;  %421 = vmatpush.msra.mxu1 %v240_v4  ;;  %p589_p8 = pneg %p588_p4 }
  0x2f   : > { %250 = vmatpush.msra.mxu0 %v239_v5  ;;  %422 = vmatpush.msra.mxu1 %v239_v5  ;;  %p594_p0 = pnand %p593_p13, %p589_p8 }
  0x31   : > { %251 = vmatpush.msra.mxu0 %v238_v6  ;;  %423 = vmatpush.msra.mxu1 %v238_v6 }
  0x33   : > { %252 = vmatpush.msra.mxu0 %v237_v7  ;;  %424 = vmatpush.msra.mxu1 %v237_v7 }
  0x35   : > { %253 = vmatpush.msra.mxu0 %v236_v8  ;;  %425 = vmatpush.msra.mxu1 %v236_v8 }
  0x37   : > { %254 = vmatpush.msra.mxu0 %v235_v9  ;;  %426 = vmatpush.msra.mxu1 %v235_v9 }
  0x39   : > { %255 = vmatpush.msra.mxu0 %v234_v10  ;;  %427 = vmatpush.msra.mxu1 %v234_v10 }
  0x3b   : > { %256 = vmatpush.msra.mxu0 %v233_v11  ;;  %428 = vmatpush.msra.mxu1 %v233_v11 }
  0x3d   : > { %257 = vmatpush.msra.mxu0 %v232_v12  ;;  %429 = vmatpush.msra.mxu1 %v232_v12 }
  0x3f   : > { %258 = vmatpush.msra.mxu0 %v231_v13  ;;  %430 = vmatpush.msra.mxu1 %v231_v13 }
  0x41   : > { %259 = vmatpush.msra.mxu0 %v230_v14  ;;  %431 = vmatpush.msra.mxu1 %v230_v14 }
  0x43   : > { %260 = vmatpush.msra.mxu0 %v229_v15  ;;  %432 = vmatpush.msra.mxu1 %v229_v15 }
  0x44   : > { %261 = vmatmul.f32.vlgmr.msra.gmra.mxu0 %v227_v16  ;;  %264 = vmatmul.f32.vlgmr.msra.gmra.mxu1 %v228_v17 }
  0xc1   : > { %v262_v18 = vpop.f32.mrf.mxu0  ;;  %v265_v19 = vpop.f32.mrf.mxu1 }
  0xc2   : > { %277 = vst [vmem:[%s215_s28] sm:$0xff] %v262_v18 }
  0xc3   : > { %278 = vst [vmem:[%s215_s28 + $0x8] sm:$0xff] %v265_v19 }
  0xc4   : > { %597 = shalt.err (!%p594_p0)
}
  0xc5   : > { %s661_s30 = smov 128   ;;  %s662_s5 = smov 8  }
  0xc6   : > { %439 = dma.vmem_to_hbm [thread:$0]  (%p760_p5), %s294_s6, 256, %s296_s15, %s280_s16, %s661_s30, %s661_s30, %s662_s5  }
  0xc7 PF: > { %s310_s7 = sand.u32 1, %s636_s9   ;;  %p450_p3 = pnand %p402_p11, %p727_p6 }
  0xc8   : > { %s311_s3 = scalar_lea.sflag [#allocation5], %s310_s7 }
  0xc9   : > { %p451_p7 = pneg %p450_p3 }
  0xcb   : > { %631 = dma.done.wait (%p451_p7), %s311_s3, 256  }
  0xcc   : > { %633 = vsyncadd (%p451_p7), %s311_s3, 4294967040  ;;  %s19_s14 = sadd.s32 1, %s656_s14   ;;  %s851_s9 = smov %s640_s10 }
  0xcd   : > { %p16_p9 = scmp.ge.s32.totalorder %s19_s14, 4   ;;  %s852_s10 = smov %s644_s11 }
  0xce   : > { %s853_s11 = smov %s769_s8  ;;  %s854_s12 = smov %s652_s13 }
  0xcf   : > { %s855_s13 = smov %s857_s29  ;;  %18 = sbr.rel (!%p16_p9) target bundleno = 7 (0x7), region = 86 }
  0xd4   :  { %317 = vsyncpa [#allocation4], 1 }
  0xd5   :  { %319 = vsyncpa [#allocation4 + $0x1], 1 }
  0xd6   :  { %320 = vsyncpa [#allocation7], 1 }
  0xd7   :  { %321 = vsyncpa [#allocation5], 1 }
  0xd8   :  { %323 = vsyncpa [#allocation5 + $0x1], 1 }

</bundles_post_ra>
